<compile_context>
chip_gen: v7x
topology: tpu7x:2x2x1
jax: 0.10.0
libtpu: 0.0.40
codegen_flags: <defaults>
</compile_context>

<pallas_src>
import math

import jax
import jax.numpy as jnp
from jax.experimental import pallas as pl
from jax.experimental.pallas import tpu as pltpu


def _vmem_budget_bytes():
    """Scoped-VMEM limit aware of physical VMEM (v5e/v6e: 128 MiB, v7x: 64 MiB/TC)."""
    try:
        cap = int(pltpu.get_tpu_info().vmem_capacity_bytes)
    except Exception:
        cap = 64 << 20                      # conservative default (v7x per-TensorCore)
    return min(int(cap * 0.8), 112 << 20)   # leave headroom for the compiler


def make_transformer_block(B, S, D, H, D_FF, block_b=None, use_bf16_matmul=False,
                           head_batched=True):
    assert D % H == 0
    dk = D // H

    vmem_limit = _vmem_budget_bytes()

    if block_b is None:
        # Per-grid-step VMEM accounting (f32 bytes): resident weights (double-buffered
        # by BlockSpec) + per-batch-row activation transients INCLUDING the O(S^2)
        # score/prob term that the old heuristic ignored.
        wbytes = 4 * (D * 3 * D + D * D + 2 * D * D_FF + 16 * D + 2 * D_FF)
        act_row = 4 * S * (2 * 2 * D        # x + out blocks, double-buffered
                           + 3 * D          # fused qkv
                           + 2 * D_FF       # ffn hidden (+relu copy)
                           + 6 * D)         # attn out / residual / LN temporaries
        act_row += 4 * 2 * H * S * S        # per-head scores + probs (f32)
        budget = max(vmem_limit - 2 * wbytes - (2 << 20), 1 << 20)
        block_b = max(1, min(B, budget // max(act_row, 1)))
        if B >= 2:
            # Keep >= 2 grid steps so dimension_semantics=("parallel",) can shard the
            # grid across both v7x TensorCores (no effect on single-TC v5e/v6e).
            block_b = min(block_b, B // 2)
        while B % block_b:
            block_b -= 1
    TB = block_b
    assert B % TB == 0
    R = TB * S                              # flattened rows handled per grid step

    def kernel(x_ref, wqkv_ref, bqkv_ref, wo_ref, bo_ref,
               g1_ref, be1_ref, w1_ref, b1_ref, w2_ref, b2_ref,
               g2_ref, be2_ref, out_ref, *scratch):
        wdt = wqkv_ref.dtype                # bf16 fast path for MXU operands if enabled

        x2 = x_ref[...].reshape(R, D)       # leading-dim merge only (layout no-op)

        # --- fused QKV projection (1/sqrt(dk) already folded into Q columns) ---
        qkv = jnp.dot(x2.astype(wdt), wqkv_ref[...],
                      preferred_element_type=jnp.float32) + bqkv_ref[...]   # [R, 3D]

        if head_batched:
            # Columns are ordered (q|k|v, head, dk), so the head split is a pure
            # reshape of the minor dim -- no strided per-head slicing.
            q4 = qkv[:, 0:D].reshape(TB, S, H, dk)
            k4 = qkv[:, D:2 * D].reshape(TB, S, H, dk)
            v4 = qkv[:, 2 * D:3 * D].reshape(TB, S, H, dk)
            s = jnp.einsum('bqhd,bkhd->bhqk', q4.astype(wdt), k4.astype(wdt),
                           preferred_element_type=jnp.float32)              # [TB,H,S,S]
            s = s - jnp.max(s, axis=-1, keepdims=True)
            p = jnp.exp(s)
            p = p * pl.reciprocal(jnp.sum(p, axis=-1, keepdims=True), approx=True)
            a = jnp.einsum('bhqk,bkhd->bqhd', p.astype(wdt), v4.astype(wdt),
                           preferred_element_type=jnp.float32)              # [TB,S,H,dk]
            attn2 = a.reshape(R, D)         # head merge -> straight into Wo matmul
        else:
            # Fallback path (only previously-validated ops): per-head 3-D einsums with
            # lane-slice writes into a VMEM scratch.
            (attn_ref,) = scratch
            qkv3 = qkv.reshape(TB, S, 3 * D)
            for h in range(H):
                qh = qkv3[:, :, h * dk:(h + 1) * dk]
                kh = qkv3[:, :, D + h * dk:D + (h + 1) * dk]
                vh = qkv3[:, :, 2 * D + h * dk:2 * D + (h + 1) * dk]
                sh = jnp.einsum('bqd,bkd->bqk', qh, kh,
                                preferred_element_type=jnp.float32)
                sh = sh - jnp.max(sh, axis=-1, keepdims=True)
                ph = jnp.exp(sh)
                ph = ph * pl.reciprocal(jnp.sum(ph, axis=-1, keepdims=True), approx=True)
                attn_ref[:, :, h * dk:(h + 1) * dk] = jnp.einsum(
                    'bqk,bkd->bqd', ph, vh, preferred_element_type=jnp.float32)
            attn2 = attn_ref[...].reshape(R, D)

        attn_out = jnp.dot(attn2.astype(wdt), wo_ref[...],
                           preferred_element_type=jnp.float32) + bo_ref[...]

        inv_d = 1.0 / D

        def layernorm(t, g, b):
            # One-pass mean/variance (single reduction sweep per statistic pair).
            mu = jnp.sum(t, axis=-1, keepdims=True) * inv_d
            var = jnp.sum(t * t, axis=-1, keepdims=True) * inv_d - mu * mu
            return (t - mu) * jax.lax.rsqrt(var + 1e-5) * g + b

        # residual + norm1 (dropout = identity in eval mode)
        x1 = layernorm(x2 + attn_out, g1_ref[...], be1_ref[...])

        # feed-forward: Linear -> ReLU -> Linear
        hdn = jnp.maximum(
            jnp.dot(x1.astype(wdt), w1_ref[...],
                    preferred_element_type=jnp.float32) + b1_ref[...], 0.0)
        ff = jnp.dot(hdn.astype(wdt), w2_ref[...],
                     preferred_element_type=jnp.float32) + b2_ref[...]

        # residual + norm2
        y = layernorm(x1 + ff, g2_ref[...], be2_ref[...])
        out_ref[...] = y.reshape(TB, S, D)

    def full(shape):
        return pl.BlockSpec(shape, lambda i: tuple(0 for _ in shape))

    in_specs = [
        pl.BlockSpec((TB, S, D), lambda i: (i, 0, 0)),   # x
        full((D, 3 * D)), full((1, 3 * D)),              # fused Wqkv, bqkv
        full((D, D)), full((1, D)),                      # Wo, bo
        full((1, D)), full((1, D)),                      # norm1 gamma, beta
        full((D, D_FF)), full((1, D_FF)),                # W1, b1
        full((D_FF, D)), full((1, D)),                   # W2, b2
        full((1, D)), full((1, D)),                      # norm2 gamma, beta
    ]
    scratch_shapes = [] if head_batched else [pltpu.VMEM((TB, S, D), jnp.float32)]

    call = pl.pallas_call(
        kernel,
        out_shape=jax.ShapeDtypeStruct((B, S, D), jnp.float32),
        grid_spec=pltpu.PrefetchScalarGridSpec(
            num_scalar_prefetch=0,
            grid=(B // TB,),
            in_specs=in_specs,
            out_specs=pl.BlockSpec((TB, S, D), lambda i: (i, 0, 0)),
            scratch_shapes=scratch_shapes,
        ),
        compiler_params=pltpu.CompilerParams(
            dimension_semantics=("parallel",),
            vmem_limit_bytes=int(vmem_limit)),
    )

    scale = 1.0 / math.sqrt(dk)
    wdt = jnp.bfloat16 if use_bf16_matmul else jnp.float32

    def fwd(x, wq, bq, wk, bk, wv, bv, wo, bo, g1, be1, w1, b1, w2, b2, g2, be2):
        # Fuse Q/K/V weights into one [D, 3D] operand in (q|k|v, head, dk) column
        # order; fold the 1/sqrt(dk) attention scale into the Q columns (host-side
        # constant folding, zero runtime cost).
        wqkv = jnp.concatenate([wq * scale, wk, wv], axis=1).astype(wdt)
        bqkv = jnp.concatenate([bq * scale, bk, bv], axis=1)
        return call(x, wqkv, bqkv, wo.astype(wdt), bo, g1, be1,
                    w1.astype(wdt), b1, w2.astype(wdt), b2, g2, be2)

    return jax.jit(fwd)


def transformer_block_ref(x, params, H):
    """Pure-JAX reference mirroring the PyTorch forward (eval mode, mask=None)."""
    (wq, bq, wk, bk, wv, bv, wo, bo, g1, be1, w1, b1, w2, b2, g2, be2) = params
    B, S, D = x.shape
    dk = D // H

    def ln(t, g, b):
        mu = jnp.mean(t, axis=-1, keepdims=True)
        var = jnp.mean((t - mu) ** 2, axis=-1, keepdims=True)
        return (t - mu) / jnp.sqrt(var + 1e-5) * g + b

    q = (x @ wq + bq).reshape(B, S, H, dk).transpose(0, 2, 1, 3)
    k = (x @ wk + bk).reshape(B, S, H, dk).transpose(0, 2, 1, 3)
    v = (x @ wv + bv).reshape(B, S, H, dk).transpose(0, 2, 1, 3)
    s = jnp.einsum("bhqd,bhkd->bhqk", q, k) / math.sqrt(dk)
    p = jax.nn.softmax(s, axis=-1)
    a = jnp.einsum("bhqk,bhkd->bhqd", p, v)
    a = a.transpose(0, 2, 1, 3).reshape(B, S, D)
    attn_out = a @ wo + bo
    x1 = ln(x + attn_out, g1, be1)
    ff = jnp.maximum(x1 @ w1 + b1, 0.0) @ w2 + b2
    return ln(x1 + ff, g2, be2)


if __name__ == "__main__":
    B, S, D, H, D_FF = 2, 8, 32, 4, 64

    key = jax.random.PRNGKey(0)
    keys = jax.random.split(key, 13)

    # Deterministic parameter init (weights stored as [in, out], i.e. already
    # transposed relative to torch.nn.Linear's [out, in]).
    def w(k, shape, fan_in):
        bound = 1.0 / math.sqrt(fan_in)
        return jax.random.uniform(k, shape, jnp.float32, -bound, bound)

    wq = w(keys[0], (D, D), D);   bq = w(keys[1], (1, D), D)
    wk = w(keys[2], (D, D), D);   bk = w(keys[3], (1, D), D)
    wv = w(keys[4], (D, D), D);   bv = w(keys[5], (1, D), D)
    wo = w(keys[6], (D, D), D);   bo = w(keys[7], (1, D), D)
    g1 = jnp.ones((1, D), jnp.float32); be1 = jnp.zeros((1, D), jnp.float32)
    w1 = w(keys[8], (D, D_FF), D);     b1 = w(keys[9], (1, D_FF), D)
    w2 = w(keys[10], (D_FF, D), D_FF); b2 = w(keys[11], (1, D), D_FF)
    g2 = jnp.ones((1, D), jnp.float32); be2 = jnp.zeros((1, D), jnp.float32)

    params = (wq, bq, wk, bk, wv, bv, wo, bo, g1, be1, w1, b1, w2, b2, g2, be2)

    x = jax.random.normal(keys[12], (B, S, D), jnp.float32)
    ref = transformer_block_ref(x, params, H)

    def run(head_batched):
        block = make_transformer_block(B, S, D, H, D_FF, head_batched=head_batched)
        out = jax.block_until_ready(block(x, *params))
        assert out.shape == (B, S, D)
        # Tolerance covers the EUP approximate-reciprocal softmax normalization and
        # the one-pass LayerNorm variance (far below any real bug).
        assert jnp.allclose(out, ref, atol=5e-3, rtol=5e-3), "mismatch vs reference"
        return out

    try:
        run(head_batched=True)        # preferred: head-batched attention einsums
    except Exception:
        run(head_batched=False)       # fallback: per-head-loop path (validated ops only)

    print("KERNEL_OK")
</pallas_src>

<mosaic_0001>
module attributes {stable_mosaic.version = 11 : i64} {
  func.func @kernel(%arg0: i32, %arg1: memref<1x8x32xf32, #tpu.memory_space<vmem>>, %arg2: memref<32x96xf32, #tpu.memory_space<vmem>>, %arg3: memref<1x96xf32, #tpu.memory_space<vmem>>, %arg4: memref<32x32xf32, #tpu.memory_space<vmem>>, %arg5: memref<1x32xf32, #tpu.memory_space<vmem>>, %arg6: memref<1x32xf32, #tpu.memory_space<vmem>>, %arg7: memref<1x32xf32, #tpu.memory_space<vmem>>, %arg8: memref<32x64xf32, #tpu.memory_space<vmem>>, %arg9: memref<1x64xf32, #tpu.memory_space<vmem>>, %arg10: memref<64x32xf32, #tpu.memory_space<vmem>>, %arg11: memref<1x32xf32, #tpu.memory_space<vmem>>, %arg12: memref<1x32xf32, #tpu.memory_space<vmem>>, %arg13: memref<1x32xf32, #tpu.memory_space<vmem>>, %arg14: memref<1x8x32xf32, #tpu.memory_space<vmem>>, %arg15: memref<1x8x32xf32, #tpu.memory_space<vmem>>) attributes {dimension_semantics = [#tpu.dimension_semantics<parallel>], iteration_bounds = array<i64: 2>, scalar_prefetch = 0 : i64, scratch_operands = 1 : i64, tpu.core_type = #tpu.core_type<tc>, window_params = [{transform_indices = @transform_0, window_bounds = array<i64: 1, 8, 32>}, {pipeline_mode = #tpu.pipeline_mode<synchronous>, transform_indices = @transform_1, window_bounds = array<i64: 32, 96>}, {pipeline_mode = #tpu.pipeline_mode<synchronous>, transform_indices = @transform_2, window_bounds = array<i64: 1, 96>}, {pipeline_mode = #tpu.pipeline_mode<synchronous>, transform_indices = @transform_3, window_bounds = array<i64: 32, 32>}, {pipeline_mode = #tpu.pipeline_mode<synchronous>, transform_indices = @transform_4, window_bounds = array<i64: 1, 32>}, {pipeline_mode = #tpu.pipeline_mode<synchronous>, transform_indices = @transform_5, window_bounds = array<i64: 1, 32>}, {pipeline_mode = #tpu.pipeline_mode<synchronous>, transform_indices = @transform_6, window_bounds = array<i64: 1, 32>}, {pipeline_mode = #tpu.pipeline_mode<synchronous>, transform_indices = @transform_7, window_bounds = array<i64: 32, 64>}, {pipeline_mode = #tpu.pipeline_mode<synchronous>, transform_indices = @transform_8, window_bounds = array<i64: 1, 64>}, {pipeline_mode = #tpu.pipeline_mode<synchronous>, transform_indices = @transform_9, window_bounds = array<i64: 64, 32>}, {pipeline_mode = #tpu.pipeline_mode<synchronous>, transform_indices = @transform_10, window_bounds = array<i64: 1, 32>}, {pipeline_mode = #tpu.pipeline_mode<synchronous>, transform_indices = @transform_11, window_bounds = array<i64: 1, 32>}, {pipeline_mode = #tpu.pipeline_mode<synchronous>, transform_indices = @transform_12, window_bounds = array<i64: 1, 32>}, {transform_indices = @transform_13, window_bounds = array<i64: 1, 8, 32>}]} {
    %c0 = arith.constant 0 : index
    %c0_0 = arith.constant 0 : index
    %c0_1 = arith.constant 0 : index
    %0 = vector.load %arg1[%c0, %c0_0, %c0_1] : memref<1x8x32xf32, #tpu.memory_space<vmem>>, vector<1x8x32xf32>
    %1 = vector.shape_cast %0 : vector<1x8x32xf32> to vector<8x32xf32>
    %c0_2 = arith.constant 0 : index
    %c0_3 = arith.constant 0 : index
    %2 = vector.load %arg2[%c0_2, %c0_3] : memref<32x96xf32, #tpu.memory_space<vmem>>, vector<32x96xf32>
    %cst = arith.constant dense<0.000000e+00> : vector<8x96xf32>
    %3 = tpu.matmul %1, %2, %cst {dimension_numbers = #tpu.dot_dimension_numbers<[1], [0], [0], [1], [0, 0, 1, 1], [], []>} : vector<8x32xf32>, vector<32x96xf32>, vector<8x96xf32> -> vector<8x96xf32>
    %c0_4 = arith.constant 0 : index
    %c0_5 = arith.constant 0 : index
    %4 = vector.load %arg3[%c0_4, %c0_5] : memref<1x96xf32, #tpu.memory_space<vmem>>, vector<1x96xf32>
    %5 = vector.broadcast %4 : vector<1x96xf32> to vector<8x96xf32>
    %6 = arith.addf %3, %5 : vector<8x96xf32>
    %7 = vector.shape_cast %6 : vector<8x96xf32> to vector<1x8x96xf32>
    %8 = vector.extract_strided_slice %7 {offsets = [0, 0, 0], sizes = [1, 8, 8], strides = [1, 1, 1]} : vector<1x8x96xf32> to vector<1x8x8xf32>
    %9 = vector.extract_strided_slice %7 {offsets = [0, 0, 32], sizes = [1, 8, 8], strides = [1, 1, 1]} : vector<1x8x96xf32> to vector<1x8x8xf32>
    %10 = vector.extract_strided_slice %7 {offsets = [0, 0, 64], sizes = [1, 8, 8], strides = [1, 1, 1]} : vector<1x8x96xf32> to vector<1x8x8xf32>
    "tpu.trace_start"() <{level = 10 : i32, message = "bqd,bkd->bqk"}> : () -> ()
    %cst_6 = arith.constant dense<0.000000e+00> : vector<1x8x8xf32>
    %11 = tpu.matmul %8, %9, %cst_6 {dimension_numbers = #tpu.dot_dimension_numbers<[2], [2], [1], [1], [0, 0, 0, 1, 1, 1], [0], [0]>} : vector<1x8x8xf32>, vector<1x8x8xf32>, vector<1x8x8xf32> -> vector<1x8x8xf32>
    "tpu.trace_stop"() : () -> ()
    %cst_7 = arith.constant dense<0xFF800000> : vector<1x8xf32>
    %12 = vector.multi_reduction <maximumf>, %11, %cst_7 [2] : vector<1x8x8xf32> to vector<1x8xf32>
    %13 = vector.shape_cast %12 : vector<1x8xf32> to vector<1x8x1xf32>
    %14 = vector.broadcast %13 : vector<1x8x1xf32> to vector<1x8x8xf32>
    %15 = arith.subf %11, %14 : vector<1x8x8xf32>
    %16 = math.exp %15 : vector<1x8x8xf32>
    %cst_8 = arith.constant dense<0.000000e+00> : vector<1x8xf32>
    %17 = vector.multi_reduction <add>, %16, %cst_8 [2] : vector<1x8x8xf32> to vector<1x8xf32>
    %18 = vector.shape_cast %17 : vector<1x8xf32> to vector<1x8x1xf32>
    %19 = tpu.reciprocal %18 {approx = true} : vector<1x8x1xf32> -> vector<1x8x1xf32>
    %20 = vector.broadcast %19 : vector<1x8x1xf32> to vector<1x8x8xf32>
    %21 = arith.mulf %16, %20 : vector<1x8x8xf32>
    "tpu.trace_start"() <{level = 10 : i32, message = "bqk,bkd->bqd"}> : () -> ()
    %cst_9 = arith.constant dense<0.000000e+00> : vector<1x8x8xf32>
    %22 = tpu.matmul %21, %10, %cst_9 {dimension_numbers = #tpu.dot_dimension_numbers<[2], [1], [1], [2], [0, 0, 0, 1, 1, 2], [0], [0]>} : vector<1x8x8xf32>, vector<1x8x8xf32>, vector<1x8x8xf32> -> vector<1x8x8xf32>
    "tpu.trace_stop"() : () -> ()
    %c0_10 = arith.constant 0 : index
    %c0_11 = arith.constant 0 : index
    %c0_12 = arith.constant 0 : index
    %23 = vector.load %arg15[%c0_10, %c0_11, %c0_12] : memref<1x8x32xf32, #tpu.memory_space<vmem>>, vector<1x8x8xf32>
    tpu.vector_store %arg15[%c0_10, %c0_11, %c0_12], %22 {strides = array<i32>} : memref<1x8x32xf32, #tpu.memory_space<vmem>>, vector<1x8x8xf32>,
    %24 = vector.extract_strided_slice %7 {offsets = [0, 0, 8], sizes = [1, 8, 8], strides = [1, 1, 1]} : vector<1x8x96xf32> to vector<1x8x8xf32>
    %25 = vector.extract_strided_slice %7 {offsets = [0, 0, 40], sizes = [1, 8, 8], strides = [1, 1, 1]} : vector<1x8x96xf32> to vector<1x8x8xf32>
    %26 = vector.extract_strided_slice %7 {offsets = [0, 0, 72], sizes = [1, 8, 8], strides = [1, 1, 1]} : vector<1x8x96xf32> to vector<1x8x8xf32>
    "tpu.trace_start"() <{level = 10 : i32, message = "bqd,bkd->bqk"}> : () -> ()
    %cst_13 = arith.constant dense<0.000000e+00> : vector<1x8x8xf32>
    %27 = tpu.matmul %24, %25, %cst_13 {dimension_numbers = #tpu.dot_dimension_numbers<[2], [2], [1], [1], [0, 0, 0, 1, 1, 1], [0], [0]>} : vector<1x8x8xf32>, vector<1x8x8xf32>, vector<1x8x8xf32> -> vector<1x8x8xf32>
    "tpu.trace_stop"() : () -> ()
    %cst_14 = arith.constant dense<0xFF800000> : vector<1x8xf32>
    %28 = vector.multi_reduction <maximumf>, %27, %cst_14 [2] : vector<1x8x8xf32> to vector<1x8xf32>
    %29 = vector.shape_cast %28 : vector<1x8xf32> to vector<1x8x1xf32>
    %30 = vector.broadcast %29 : vector<1x8x1xf32> to vector<1x8x8xf32>
    %31 = arith.subf %27, %30 : vector<1x8x8xf32>
    %32 = math.exp %31 : vector<1x8x8xf32>
    %cst_15 = arith.constant dense<0.000000e+00> : vector<1x8xf32>
    %33 = vector.multi_reduction <add>, %32, %cst_15 [2] : vector<1x8x8xf32> to vector<1x8xf32>
    %34 = vector.shape_cast %33 : vector<1x8xf32> to vector<1x8x1xf32>
    %35 = tpu.reciprocal %34 {approx = true} : vector<1x8x1xf32> -> vector<1x8x1xf32>
    %36 = vector.broadcast %35 : vector<1x8x1xf32> to vector<1x8x8xf32>
    %37 = arith.mulf %32, %36 : vector<1x8x8xf32>
    "tpu.trace_start"() <{level = 10 : i32, message = "bqk,bkd->bqd"}> : () -> ()
    %cst_16 = arith.constant dense<0.000000e+00> : vector<1x8x8xf32>
    %38 = tpu.matmul %37, %26, %cst_16 {dimension_numbers = #tpu.dot_dimension_numbers<[2], [1], [1], [2], [0, 0, 0, 1, 1, 2], [0], [0]>} : vector<1x8x8xf32>, vector<1x8x8xf32>, vector<1x8x8xf32> -> vector<1x8x8xf32>
    "tpu.trace_stop"() : () -> ()
    %c0_17 = arith.constant 0 : index
    %c0_18 = arith.constant 0 : index
    %c8 = arith.constant 8 : index
    %39 = vector.load %arg15[%c0_17, %c0_18, %c8] : memref<1x8x32xf32, #tpu.memory_space<vmem>>, vector<1x8x8xf32>
    tpu.vector_store %arg15[%c0_17, %c0_18, %c8], %38 {strides = array<i32>} : memref<1x8x32xf32, #tpu.memory_space<vmem>>, vector<1x8x8xf32>,
    %40 = vector.extract_strided_slice %7 {offsets = [0, 0, 16], sizes = [1, 8, 8], strides = [1, 1, 1]} : vector<1x8x96xf32> to vector<1x8x8xf32>
    %41 = vector.extract_strided_slice %7 {offsets = [0, 0, 48], sizes = [1, 8, 8], strides = [1, 1, 1]} : vector<1x8x96xf32> to vector<1x8x8xf32>
    %42 = vector.extract_strided_slice %7 {offsets = [0, 0, 80], sizes = [1, 8, 8], strides = [1, 1, 1]} : vector<1x8x96xf32> to vector<1x8x8xf32>
    "tpu.trace_start"() <{level = 10 : i32, message = "bqd,bkd->bqk"}> : () -> ()
    %cst_19 = arith.constant dense<0.000000e+00> : vector<1x8x8xf32>
    %43 = tpu.matmul %40, %41, %cst_19 {dimension_numbers = #tpu.dot_dimension_numbers<[2], [2], [1], [1], [0, 0, 0, 1, 1, 1], [0], [0]>} : vector<1x8x8xf32>, vector<1x8x8xf32>, vector<1x8x8xf32> -> vector<1x8x8xf32>
    "tpu.trace_stop"() : () -> ()
    %cst_20 = arith.constant dense<0xFF800000> : vector<1x8xf32>
    %44 = vector.multi_reduction <maximumf>, %43, %cst_20 [2] : vector<1x8x8xf32> to vector<1x8xf32>
    %45 = vector.shape_cast %44 : vector<1x8xf32> to vector<1x8x1xf32>
    %46 = vector.broadcast %45 : vector<1x8x1xf32> to vector<1x8x8xf32>
    %47 = arith.subf %43, %46 : vector<1x8x8xf32>
    %48 = math.exp %47 : vector<1x8x8xf32>
    %cst_21 = arith.constant dense<0.000000e+00> : vector<1x8xf32>
    %49 = vector.multi_reduction <add>, %48, %cst_21 [2] : vector<1x8x8xf32> to vector<1x8xf32>
    %50 = vector.shape_cast %49 : vector<1x8xf32> to vector<1x8x1xf32>
    %51 = tpu.reciprocal %50 {approx = true} : vector<1x8x1xf32> -> vector<1x8x1xf32>
    %52 = vector.broadcast %51 : vector<1x8x1xf32> to vector<1x8x8xf32>
    %53 = arith.mulf %48, %52 : vector<1x8x8xf32>
    "tpu.trace_start"() <{level = 10 : i32, message = "bqk,bkd->bqd"}> : () -> ()
    %cst_22 = arith.constant dense<0.000000e+00> : vector<1x8x8xf32>
    %54 = tpu.matmul %53, %42, %cst_22 {dimension_numbers = #tpu.dot_dimension_numbers<[2], [1], [1], [2], [0, 0, 0, 1, 1, 2], [0], [0]>} : vector<1x8x8xf32>, vector<1x8x8xf32>, vector<1x8x8xf32> -> vector<1x8x8xf32>
    "tpu.trace_stop"() : () -> ()
    %c0_23 = arith.constant 0 : index
    %c0_24 = arith.constant 0 : index
    %c16 = arith.constant 16 : index
    %55 = vector.load %arg15[%c0_23, %c0_24, %c16] : memref<1x8x32xf32, #tpu.memory_space<vmem>>, vector<1x8x8xf32>
    tpu.vector_store %arg15[%c0_23, %c0_24, %c16], %54 {strides = array<i32>} : memref<1x8x32xf32, #tpu.memory_space<vmem>>, vector<1x8x8xf32>,
    %56 = vector.extract_strided_slice %7 {offsets = [0, 0, 24], sizes = [1, 8, 8], strides = [1, 1, 1]} : vector<1x8x96xf32> to vector<1x8x8xf32>
    %57 = vector.extract_strided_slice %7 {offsets = [0, 0, 56], sizes = [1, 8, 8], strides = [1, 1, 1]} : vector<1x8x96xf32> to vector<1x8x8xf32>
    %58 = vector.extract_strided_slice %7 {offsets = [0, 0, 88], sizes = [1, 8, 8], strides = [1, 1, 1]} : vector<1x8x96xf32> to vector<1x8x8xf32>
    "tpu.trace_start"() <{level = 10 : i32, message = "bqd,bkd->bqk"}> : () -> ()
    %cst_25 = arith.constant dense<0.000000e+00> : vector<1x8x8xf32>
    %59 = tpu.matmul %56, %57, %cst_25 {dimension_numbers = #tpu.dot_dimension_numbers<[2], [2], [1], [1], [0, 0, 0, 1, 1, 1], [0], [0]>} : vector<1x8x8xf32>, vector<1x8x8xf32>, vector<1x8x8xf32> -> vector<1x8x8xf32>
    "tpu.trace_stop"() : () -> ()
    %cst_26 = arith.constant dense<0xFF800000> : vector<1x8xf32>
    %60 = vector.multi_reduction <maximumf>, %59, %cst_26 [2] : vector<1x8x8xf32> to vector<1x8xf32>
    %61 = vector.shape_cast %60 : vector<1x8xf32> to vector<1x8x1xf32>
    %62 = vector.broadcast %61 : vector<1x8x1xf32> to vector<1x8x8xf32>
    %63 = arith.subf %59, %62 : vector<1x8x8xf32>
    %64 = math.exp %63 : vector<1x8x8xf32>
    %cst_27 = arith.constant dense<0.000000e+00> : vector<1x8xf32>
    %65 = vector.multi_reduction <add>, %64, %cst_27 [2] : vector<1x8x8xf32> to vector<1x8xf32>
    %66 = vector.shape_cast %65 : vector<1x8xf32> to vector<1x8x1xf32>
    %67 = tpu.reciprocal %66 {approx = true} : vector<1x8x1xf32> -> vector<1x8x1xf32>
    %68 = vector.broadcast %67 : vector<1x8x1xf32> to vector<1x8x8xf32>
    %69 = arith.mulf %64, %68 : vector<1x8x8xf32>
    "tpu.trace_start"() <{level = 10 : i32, message = "bqk,bkd->bqd"}> : () -> ()
    %cst_28 = arith.constant dense<0.000000e+00> : vector<1x8x8xf32>
    %70 = tpu.matmul %69, %58, %cst_28 {dimension_numbers = #tpu.dot_dimension_numbers<[2], [1], [1], [2], [0, 0, 0, 1, 1, 2], [0], [0]>} : vector<1x8x8xf32>, vector<1x8x8xf32>, vector<1x8x8xf32> -> vector<1x8x8xf32>
    "tpu.trace_stop"() : () -> ()
    %c0_29 = arith.constant 0 : index
    %c0_30 = arith.constant 0 : index
    %c24 = arith.constant 24 : index
    %71 = vector.load %arg15[%c0_29, %c0_30, %c24] : memref<1x8x32xf32, #tpu.memory_space<vmem>>, vector<1x8x8xf32>
    tpu.vector_store %arg15[%c0_29, %c0_30, %c24], %70 {strides = array<i32>} : memref<1x8x32xf32, #tpu.memory_space<vmem>>, vector<1x8x8xf32>,
    %c0_31 = arith.constant 0 : index
    %c0_32 = arith.constant 0 : index
    %c0_33 = arith.constant 0 : index
    %72 = vector.load %arg15[%c0_31, %c0_32, %c0_33] : memref<1x8x32xf32, #tpu.memory_space<vmem>>, vector<1x8x32xf32>
    %73 = vector.shape_cast %72 : vector<1x8x32xf32> to vector<8x32xf32>
    %c0_34 = arith.constant 0 : index
    %c0_35 = arith.constant 0 : index
    %74 = vector.load %arg4[%c0_34, %c0_35] : memref<32x32xf32, #tpu.memory_space<vmem>>, vector<32x32xf32>
    %cst_36 = arith.constant dense<0.000000e+00> : vector<8x32xf32>
    %75 = tpu.matmul %73, %74, %cst_36 {dimension_numbers = #tpu.dot_dimension_numbers<[1], [0], [0], [1], [0, 0, 1, 1], [], []>} : vector<8x32xf32>, vector<32x32xf32>, vector<8x32xf32> -> vector<8x32xf32>
    %c0_37 = arith.constant 0 : index
    %c0_38 = arith.constant 0 : index
    %76 = vector.load %arg5[%c0_37, %c0_38] : memref<1x32xf32, #tpu.memory_space<vmem>>, vector<1x32xf32>
    %77 = vector.broadcast %76 : vector<1x32xf32> to vector<8x32xf32>
    %78 = arith.addf %75, %77 : vector<8x32xf32>
    %79 = arith.addf %1, %78 : vector<8x32xf32>
    %c0_39 = arith.constant 0 : index
    %c0_40 = arith.constant 0 : index
    %80 = vector.load %arg6[%c0_39, %c0_40] : memref<1x32xf32, #tpu.memory_space<vmem>>, vector<1x32xf32>
    %c0_41 = arith.constant 0 : index
    %c0_42 = arith.constant 0 : index
    %81 = vector.load %arg7[%c0_41, %c0_42] : memref<1x32xf32, #tpu.memory_space<vmem>>, vector<1x32xf32>
    %cst_43 = arith.constant dense<0.000000e+00> : vector<8xf32>
    %82 = vector.multi_reduction <add>, %79, %cst_43 [1] : vector<8x32xf32> to vector<8xf32>
    %83 = vector.shape_cast %82 : vector<8xf32> to vector<8x1xf32>
    %cst_44 = arith.constant 3.125000e-02 : f32
    %84 = vector.broadcast %cst_44 : f32 to vector<8x1xf32>
    %85 = arith.mulf %83, %84 : vector<8x1xf32>
    %86 = arith.mulf %79, %79 : vector<8x32xf32>
    %cst_45 = arith.constant dense<0.000000e+00> : vector<8xf32>
    %87 = vector.multi_reduction <add>, %86, %cst_45 [1] : vector<8x32xf32> to vector<8xf32>
    %88 = vector.shape_cast %87 : vector<8xf32> to vector<8x1xf32>
    %cst_46 = arith.constant 3.125000e-02 : f32
    %89 = vector.broadcast %cst_46 : f32 to vector<8x1xf32>
    %90 = arith.mulf %88, %89 : vector<8x1xf32>
    %91 = arith.mulf %85, %85 : vector<8x1xf32>
    %92 = arith.subf %90, %91 : vector<8x1xf32>
    %93 = vector.broadcast %85 : vector<8x1xf32> to vector<8x32xf32>
    %94 = arith.subf %79, %93 : vector<8x32xf32>
    %cst_47 = arith.constant 9.99999974E-6 : f32
    %95 = vector.broadcast %cst_47 : f32 to vector<8x1xf32>
    %96 = arith.addf %92, %95 : vector<8x1xf32>
    %97 = math.rsqrt %96 : vector<8x1xf32>
    %98 = vector.broadcast %97 : vector<8x1xf32> to vector<8x32xf32>
    %99 = arith.mulf %94, %98 : vector<8x32xf32>
    %100 = vector.broadcast %80 : vector<1x32xf32> to vector<8x32xf32>
    %101 = arith.mulf %99, %100 : vector<8x32xf32>
    %102 = vector.broadcast %81 : vector<1x32xf32> to vector<8x32xf32>
    %103 = arith.addf %101, %102 : vector<8x32xf32>
    %c0_48 = arith.constant 0 : index
    %c0_49 = arith.constant 0 : index
    %104 = vector.load %arg8[%c0_48, %c0_49] : memref<32x64xf32, #tpu.memory_space<vmem>>, vector<32x64xf32>
    %cst_50 = arith.constant dense<0.000000e+00> : vector<8x64xf32>
    %105 = tpu.matmul %103, %104, %cst_50 {dimension_numbers = #tpu.dot_dimension_numbers<[1], [0], [0], [1], [0, 0, 1, 1], [], []>} : vector<8x32xf32>, vector<32x64xf32>, vector<8x64xf32> -> vector<8x64xf32>
    %c0_51 = arith.constant 0 : index
    %c0_52 = arith.constant 0 : index
    %106 = vector.load %arg9[%c0_51, %c0_52] : memref<1x64xf32, #tpu.memory_space<vmem>>, vector<1x64xf32>
    %107 = vector.broadcast %106 : vector<1x64xf32> to vector<8x64xf32>
    %108 = arith.addf %105, %107 : vector<8x64xf32>
    %cst_53 = arith.constant 0.000000e+00 : f32
    %109 = vector.broadcast %cst_53 : f32 to vector<8x64xf32>
    %110 = arith.maximumf %108, %109 : vector<8x64xf32>
    %c0_54 = arith.constant 0 : index
    %c0_55 = arith.constant 0 : index
    %111 = vector.load %arg10[%c0_54, %c0_55] : memref<64x32xf32, #tpu.memory_space<vmem>>, vector<64x32xf32>
    %cst_56 = arith.constant dense<0.000000e+00> : vector<8x32xf32>
    %112 = tpu.matmul %110, %111, %cst_56 {dimension_numbers = #tpu.dot_dimension_numbers<[1], [0], [0], [1], [0, 0, 1, 1], [], []>} : vector<8x64xf32>, vector<64x32xf32>, vector<8x32xf32> -> vector<8x32xf32>
    %c0_57 = arith.constant 0 : index
    %c0_58 = arith.constant 0 : index
    %113 = vector.load %arg11[%c0_57, %c0_58] : memref<1x32xf32, #tpu.memory_space<vmem>>, vector<1x32xf32>
    %114 = vector.broadcast %113 : vector<1x32xf32> to vector<8x32xf32>
    %115 = arith.addf %112, %114 : vector<8x32xf32>
    %116 = arith.addf %103, %115 : vector<8x32xf32>
    %c0_59 = arith.constant 0 : index
    %c0_60 = arith.constant 0 : index
    %117 = vector.load %arg12[%c0_59, %c0_60] : memref<1x32xf32, #tpu.memory_space<vmem>>, vector<1x32xf32>
    %c0_61 = arith.constant 0 : index
    %c0_62 = arith.constant 0 : index
    %118 = vector.load %arg13[%c0_61, %c0_62] : memref<1x32xf32, #tpu.memory_space<vmem>>, vector<1x32xf32>
    %cst_63 = arith.constant dense<0.000000e+00> : vector<8xf32>
    %119 = vector.multi_reduction <add>, %116, %cst_63 [1] : vector<8x32xf32> to vector<8xf32>
    %120 = vector.shape_cast %119 : vector<8xf32> to vector<8x1xf32>
    %cst_64 = arith.constant 3.125000e-02 : f32
    %121 = vector.broadcast %cst_64 : f32 to vector<8x1xf32>
    %122 = arith.mulf %120, %121 : vector<8x1xf32>
    %123 = arith.mulf %116, %116 : vector<8x32xf32>
    %cst_65 = arith.constant dense<0.000000e+00> : vector<8xf32>
    %124 = vector.multi_reduction <add>, %123, %cst_65 [1] : vector<8x32xf32> to vector<8xf32>
    %125 = vector.shape_cast %124 : vector<8xf32> to vector<8x1xf32>
    %cst_66 = arith.constant 3.125000e-02 : f32
    %126 = vector.broadcast %cst_66 : f32 to vector<8x1xf32>
    %127 = arith.mulf %125, %126 : vector<8x1xf32>
    %128 = arith.mulf %122, %122 : vector<8x1xf32>
    %129 = arith.subf %127, %128 : vector<8x1xf32>
    %130 = vector.broadcast %122 : vector<8x1xf32> to vector<8x32xf32>
    %131 = arith.subf %116, %130 : vector<8x32xf32>
    %cst_67 = arith.constant 9.99999974E-6 : f32
    %132 = vector.broadcast %cst_67 : f32 to vector<8x1xf32>
    %133 = arith.addf %129, %132 : vector<8x1xf32>
    %134 = math.rsqrt %133 : vector<8x1xf32>
    %135 = vector.broadcast %134 : vector<8x1xf32> to vector<8x32xf32>
    %136 = arith.mulf %131, %135 : vector<8x32xf32>
    %137 = vector.broadcast %117 : vector<1x32xf32> to vector<8x32xf32>
    %138 = arith.mulf %136, %137 : vector<8x32xf32>
    %139 = vector.broadcast %118 : vector<1x32xf32> to vector<8x32xf32>
    %140 = arith.addf %138, %139 : vector<8x32xf32>
    %141 = vector.shape_cast %140 : vector<8x32xf32> to vector<1x8x32xf32>
    %c0_68 = arith.constant 0 : index
    %c0_69 = arith.constant 0 : index
    %c0_70 = arith.constant 0 : index
    %142 = vector.load %arg14[%c0_68, %c0_69, %c0_70] : memref<1x8x32xf32, #tpu.memory_space<vmem>>, vector<1x8x32xf32>
    tpu.vector_store %arg14[%c0_68, %c0_69, %c0_70], %141 {strides = array<i32>} : memref<1x8x32xf32, #tpu.memory_space<vmem>>, vector<1x8x32xf32>,
    return
  }
  func.func @transform_0(%arg0: i32) -> (i32, i32, i32) {
    %c0_i32 = arith.constant 0 : i32
    %c0_i32_0 = arith.constant 0 : i32
    %c0_i32_1 = arith.constant 0 : i32
    return %arg0, %c0_i32, %c0_i32_0 : i32, i32, i32
  }
  func.func @transform_1(%arg0: i32) -> (i32, i32) {
    %c0_i32 = arith.constant 0 : i32
    %c0_i32_0 = arith.constant 0 : i32
    %c0_i32_1 = arith.constant 0 : i32
    return %c0_i32, %c0_i32_0 : i32, i32
  }
  func.func @transform_2(%arg0: i32) -> (i32, i32) {
    %c0_i32 = arith.constant 0 : i32
    %c0_i32_0 = arith.constant 0 : i32
    %c0_i32_1 = arith.constant 0 : i32
    return %c0_i32, %c0_i32_0 : i32, i32
  }
  func.func @transform_3(%arg0: i32) -> (i32, i32) {
    %c0_i32 = arith.constant 0 : i32
    %c0_i32_0 = arith.constant 0 : i32
    %c0_i32_1 = arith.constant 0 : i32
    return %c0_i32, %c0_i32_0 : i32, i32
  }
  func.func @transform_4(%arg0: i32) -> (i32, i32) {
    %c0_i32 = arith.constant 0 : i32
    %c0_i32_0 = arith.constant 0 : i32
    %c0_i32_1 = arith.constant 0 : i32
    return %c0_i32, %c0_i32_0 : i32, i32
  }
  func.func @transform_5(%arg0: i32) -> (i32, i32) {
    %c0_i32 = arith.constant 0 : i32
    %c0_i32_0 = arith.constant 0 : i32
    %c0_i32_1 = arith.constant 0 : i32
    return %c0_i32, %c0_i32_0 : i32, i32
  }
  func.func @transform_6(%arg0: i32) -> (i32, i32) {
    %c0_i32 = arith.constant 0 : i32
    %c0_i32_0 = arith.constant 0 : i32
    %c0_i32_1 = arith.constant 0 : i32
    return %c0_i32, %c0_i32_0 : i32, i32
  }
  func.func @transform_7(%arg0: i32) -> (i32, i32) {
    %c0_i32 = arith.constant 0 : i32
    %c0_i32_0 = arith.constant 0 : i32
    %c0_i32_1 = arith.constant 0 : i32
    return %c0_i32, %c0_i32_0 : i32, i32
  }
  func.func @transform_8(%arg0: i32) -> (i32, i32) {
    %c0_i32 = arith.constant 0 : i32
    %c0_i32_0 = arith.constant 0 : i32
    %c0_i32_1 = arith.constant 0 : i32
    return %c0_i32, %c0_i32_0 : i32, i32
  }
  func.func @transform_9(%arg0: i32) -> (i32, i32) {
    %c0_i32 = arith.constant 0 : i32
    %c0_i32_0 = arith.constant 0 : i32
    %c0_i32_1 = arith.constant 0 : i32
    return %c0_i32, %c0_i32_0 : i32, i32
  }
  func.func @transform_10(%arg0: i32) -> (i32, i32) {
    %c0_i32 = arith.constant 0 : i32
    %c0_i32_0 = arith.constant 0 : i32
    %c0_i32_1 = arith.constant 0 : i32
    return %c0_i32, %c0_i32_0 : i32, i32
  }
  func.func @transform_11(%arg0: i32) -> (i32, i32) {
    %c0_i32 = arith.constant 0 : i32
    %c0_i32_0 = arith.constant 0 : i32
    %c0_i32_1 = arith.constant 0 : i32
    return %c0_i32, %c0_i32_0 : i32, i32
  }
  func.func @transform_12(%arg0: i32) -> (i32, i32) {
    %c0_i32 = arith.constant 0 : i32
    %c0_i32_0 = arith.constant 0 : i32
    %c0_i32_1 = arith.constant 0 : i32
    return %c0_i32, %c0_i32_0 : i32, i32
  }
  func.func @transform_13(%arg0: i32) -> (i32, i32, i32) {
    %c0_i32 = arith.constant 0 : i32
    %c0_i32_0 = arith.constant 0 : i32
    %c0_i32_1 = arith.constant 0 : i32
    return %arg0, %c0_i32, %c0_i32_0 : i32, i32, i32
  }
}

</mosaic_0001>

<bundles_post_ra>
// kernel: fwd.1
= control target key start
LH: loop header
LB: loop body
LE: loop exit
PB: predicated region body
PF: predicated region fallthrough
CT: control target
= control target key end

     0   :  { %s2295_s0 = inlined_call_operand.vmem [shape: f32[2,8,32], index: 0, kind: input, shape index: {}]   ;;  %s2296_s1 = inlined_call_operand.vmem [shape: f32[32,96], index: 1, kind: input, shape index: {}]   ;;  %s2297_s2 = inlined_call_operand.vmem [shape: f32[1,96], index: 2, kind: input, shape index: {}]   ;;  %s2298_s3 = inlined_call_operand.vmem [shape: f32[32,32], index: 3, kind: input, shape index: {}]   ;;  %s2299_s4 = inlined_call_operand.vmem [shape: f32[1,32], index: 4, kind: input, shape index: {}]   ;;  %s2300_s5 = inlined_call_operand.vmem [shape: f32[1,32], index: 5, kind: input, shape index: {}]   ;;  %s2301_s6 = inlined_call_operand.vmem [shape: f32[1,32], index: 6, kind: input, shape index: {}]   ;;  %s2302_s7 = inlined_call_operand.vmem [shape: f32[32,64], index: 7, kind: input, shape index: {}]   ;;  %s2303_s8 = inlined_call_operand.vmem [shape: f32[1,64], index: 8, kind: input, shape index: {}]   ;;  %s2304_s9 = inlined_call_operand.vmem [shape: f32[64,32], index: 9, kind: input, shape index: {}]   ;;  %s2305_s10 = inlined_call_operand.vmem [shape: f32[1,32], index: 10, kind: input, shape index: {}]   ;;  %s2306_s11 = inlined_call_operand.vmem [shape: f32[1,32], index: 11, kind: input, shape index: {}]   ;;  %s2307_s12 = inlined_call_operand.vmem [shape: f32[1,32], index: 12, kind: input, shape index: {}]   ;;  %s2308_s13 = inlined_call_operand.hbm [shape: f32[2,8,32], index: 13, kind: output, shape index: {}]  }
   0x1   :  { %2309 = sst [smem:[#allocation6_spill]] %s2295_s0 }
   0x2   :  { %2310 = sst [smem:[#allocation7_spill]] %s2296_s1 }
   0x3   :  { %2311 = sst [smem:[#allocation8_spill]] %s2297_s2 }
   0x4   :  { %2312 = sst [smem:[#allocation9_spill]] %s2298_s3 }
   0x5   :  { %18 = vsyncpa [#allocation4], 0 }
   0x6   :  { %20 = vsyncpa [#allocation4 + $0x1], 0  ;;  %s2022_s25 = smov 0   ;;  %s2024_s26 = smov 0  }
   0x7   :  { %s2026_s27 = smov 0   ;;  %s2028_s28 = smov 0  }
   0x8 LB: > { %s2043_s29 = sadd.s32 4294967295, %s1932_s28   ;;  %s1598_s30 = sadd.s32 4294967294, %s1932_s28   ;;  %s1932_s28 = sphi %s2028_s28, %s2322_s28   ;;  %s1928_s27 = sphi %s2026_s27, %s2321_s27   ;;  %s1924_s26 = sphi %s2024_s26, %s2320_s26   ;;  %s1920_s25 = sphi %s2022_s25, %s2319_s25  }
   0x9   : > { %s2047_s14 = sadd.s32 1, %s1932_s28   ;;  %s311_s15 = sadd.s32 1, %s1928_s27 }
   0xa   : > { %s308_s16 = ssub.s32 %s1932_s28, %s2047_s14  ;;  %p321_p0 = scmp.ne.s32.totalorder %s1928_s27, %s1924_s26 }
   0xb   : > { %p309_p1 = scmp.eq.s32.totalorder %s308_s16, 0  ;;  %p322_p2 = scmp.eq.s32.totalorder %s2043_s29, 1 }
   0xc   : > { %p327_p3 = scmp.ne.s32.totalorder %s1924_s26, %s1920_s25  ;;  %p328_p4 = scmp.eq.s32.totalorder %s1598_s30, 1 }
   0xd   : > { %s2058_s17 = scalar_select %p309_p1, %s1928_s27, %s311_s15  }
   0xe   : > { %p2060_p5 = por %p322_p2, %p321_p0  ;;  %p2064_p6 = por %p328_p4, %p327_p3 }
   0xf   : > { %p1601_p7 = scmp.ge.s32.totalorder %s1932_s28, 1  ;;  %p389_p8 = scmp.lt.s32.totalorder %s1932_s28, 3 }
  0x11   : > { %p390_p9 = pnand %p1601_p7, %p389_p8 }
  0x12   : > { %s2315_s1 = sld [smem:[#allocation7_spill]] (!%p390_p9)  ;;  %v1934_v3 = vmov (!%p390_p9), 0.0|0.0   ;;  %vm1935_vm0 = vmmov (!%p390_p9), 0   ;;  %v1936_v6 = vmov (!%p390_p9), 0.0   ;;  %p432_p10 = scmp.lt.s32.totalorder (!%p390_p9), %s2043_s29, 1  ;;  %vm448_vm1 = vcmask (!%p390_p9), 261120  }
  0x13   : > { %393 = sbr.rel (%p390_p9) target bundleno = 2284 (0x8ec), region = 72  ;;  %1764 = vmatprep.subr.bf16.mxu1 (!%p390_p9), %v1934_v3  ;;  %1680 = vmatprep.mubr.msk.f32.mxu1 (!%p390_p9), %vm1935_vm0, %v1936_v6  ;;  %s2316_s0 = sld [smem:[#allocation6_spill]] (!%p390_p9)  ;;  %vm525_vm2 = vcmask (!%p390_p9), 64512   ;;  %vm857_vm3 = vcmask (!%p390_p9), 130112   ;;  %vm1028_vm4 = vcmask (!%p390_p9), 195712   ;;  %vm1199_vm5 = vcmask (!%p390_p9), 261312  }
  0x14   : > { %1693 = vmatprep.subr.mxu0 (!%p390_p9), %v1936_v6  ;;  %1695 = vmatprep.mubr.msk.f32.mxu0 (!%p390_p9), %vm1935_vm0, %v1936_v6  ;;  %s2317_s2 = sld [smem:[#allocation8_spill]] (!%p390_p9)  ;;  %s1937_s16 = smov (!%p390_p9), 120   ;;  %vm1418_vm6 = vcmask (!%p390_p9), 523264  }
  0x15   : > { %s1940_s22 = smov (!%p390_p9), 88   ;;  %s1941_s23 = smov (!%p390_p9), 72  }
  0x16   : > { %s1943_s30 = smov (!%p390_p9), 104   ;;  %s1944_s15 = smov (!%p390_p9), 56  }
  0x17   : > { %s2318_s3 = sld [smem:[#allocation9_spill]] (!%p390_p9) }
  0x18   : > { %v437_v0 = vld [vmem:[%s2315_s1] sm:$0xff] (!%p390_p9)  ;;  %v438_v1 = vld [vmem:[%s2315_s1 + $0x8] sm:$0xff] (!%p390_p9)  ;;  %v439_v2 = vld [vmem:[%s2315_s1 + $0x10] sm:$0xff] (!%p390_p9) }
  0x19   : > { %v1765_v4 = vpack.c.bf16 (!%p390_p9), %v438_v1, %v437_v0  ;;  %v440_v5 = vld [vmem:[%s2315_s1 + $0x18] sm:$0xff] (!%p390_p9) }
  0x1a   : > { %v1768_v7 = vpack.c.bf16 %v440_v5, %v439_v2  ;;  %s433_s20 = scalar_select %p432_p10, %s2043_s29, 1  ;;  %v1604_v9 = vld [vmem:[%s2317_s2] ss:$0 sm:$0xff] }
  0x1b   : > { %1766 = vmatpush3.bf16.msra.mxu1 %v1765_v4 }
  0x1c   : > { %1767 = vmatprep.subr.bf16.mxu1 %v1934_v3  ;;  %s1603_s21 = sshll.u32 %s433_s20, 3  ;;  %s1938_s20 = smov 96  }
  0x1d   : > { %s435_s24 = scalar_lea.vmem %s2316_s0, %s1603_s21  ;;  %s1939_s21 = smov 80  }
  0x1e   : > { %v2094_v8 = vld [vmem:[%s435_s24] sm:$0xff]  ;;  %s1942_s24 = smov 112  }
  0x1f   : > { %1769 = vmatpush3.bf16.msra.mxu1 %v1768_v7 }
  0x20   : > { %1683 = vmatprep.subr.mxu1 %v1936_v6 }
  0x22   : > { %1681 = vmatmul.mubr.msk.f32.vlgmr.msra.gmra.mrb[0].mxu1 %vm448_vm1, %v2094_v8 }
  0x23   : > { %1685 = vmatprep.mubr.msk.f32.mxu1 %vm1935_vm0, %v1936_v6 }
  0xf5   : > { %v518_v10 = vpop.f32.mrb[0].mxu1 }
  0xf6   : > { %v2104_v11 = vadd.f32 %v1604_v9, %v518_v10  ;;  %v1682_v12 = vpop.f32.mrb[1].mxu1 }
  0xf7   : > { %v1203_v12 = vld [vmem:[%s2318_s3 + $0x8] sm:$0xff] }
  0xf8   : > { %688 = vrot.lane.b32.xlu1 %v2104_v11, %s1937_s16  ;;  %523 = vrot.lane.b32.xlu0 %v2104_v11, %s1938_s20  ;;  %s1945_s16 = smov 64   ;;  %s1946_s20 = smov 48  }
  0xfc   : > { %861 = vrot.lane.b32.xlu1 %v2104_v11, %s1939_s21  ;;  %690 = vrot.lane.b32.xlu0 %v2104_v11, %s1940_s22  ;;  %s1947_s21 = smov 40   ;;  %s1948_s22 = smov 8  }
 0x100   : > { %1032 = vrot.lane.b32.xlu1 %v2104_v11, %s1941_s23  ;;  %859 = vrot.lane.b32.xlu0 %v2104_v11, %s1942_s24  ;;  %s1950_s23 = smov 24   ;;  %s1629_s24 = sshll.u32 %s2043_s29, 7 }
 0x101   : > { %s1951_s29 = smov [#allocation3]  }
 0x104   : > { %1030 = vrot.lane.b32.xlu0 %v2104_v11, %s1943_s30 }
 0x16a   : > { %v689_v13 = vpop.permute.xlu1 %688  ;;  %v524_v14 = vpop.permute.xlu0 %523 }
 0x16b   : > { %1684 = vmatpush3.xpose.msk.msra.mxu1 %vm525_vm2, %v524_v14  ;;  %v1204_v14 = vld [vmem:[%s2318_s3 + $0x10] sm:$0xff] }
 0x16c   : > { %1688 = vmatprep.subr.mxu1 %v1936_v6 }
 0x16e   : > { %1686 = vmatmul.mubr.msk.f32.vlgmr.msra.gmra.mrb[2].mxu1 %vm525_vm2, %v2104_v11  ;;  %v691_v15 = vpop.permute.xlu0 %690  ;;  %v862_v16 = vpop.permute.xlu1 %861 }
 0x16f   : > { %1694 = vmatpush3.xpose.msk.msra.mxu0 %vm525_vm2, %v691_v15  ;;  %1690 = vmatprep.mubr.msk.f32.mxu1 %vm1935_vm0, %v1936_v6  ;;  %v1205_v15 = vld [vmem:[%s2318_s3 + $0x18] sm:$0xff] }
 0x170   : > { %1703 = vmatprep.subr.mxu0 %v1936_v6 }
 0x172   : > { %1696 = vmatmul.mubr.msk.f32.vlgmr.msra.gmra.mrb[0].mxu0 %vm525_vm2, %v689_v13  ;;  %v860_v17 = vpop.permute.xlu0 %859  ;;  %v1033_v18 = vpop.permute.xlu1 %1032 }
 0x173   : > { %1704 = vmatpush3.xpose.msk.msra.mxu0 %vm525_vm2, %v862_v16  ;;  %1705 = vmatprep.mubr.msk.f32.mxu0 %vm1935_vm0, %v1936_v6  ;;  %v1774_v16 = vpack.c.bf16 %v1205_v15, %v1204_v14 }
 0x174   : > { %1713 = vmatprep.subr.mxu0 %v1936_v6 }
 0x176   : > { %1706 = vmatmul.mubr.msk.f32.vlgmr.msra.gmra.mrb[2].mxu0 %vm525_vm2, %v860_v17  ;;  %v1031_v19 = vpop.permute.xlu0 %1030 }
 0x177   : > { %1714 = vmatpush3.xpose.msk.msra.mxu0 %vm525_vm2, %v1033_v18  ;;  %1715 = vmatprep.mubr.msk.f32.mxu0 %vm1935_vm0, %v1936_v6 }
 0x178   : > { %1770 = vmatprep.subr.bf16.mxu0 %v1934_v3 }
 0x17a   : > { %1716 = vmatmul.mubr.msk.f32.vlgmr.msra.gmra.mrb[4].mxu0 %vm525_vm2, %v1031_v19 }
 0x17b   : > { %1731 = vmatprep.mubr.msk.f32.mxu0 %vm1935_vm0, %v1936_v6 }
 0x241   : > { %v596_v20 = vpop.f32.mrb[2].mxu1 }
 0x242   : > { %v1687_v21 = vpop.f32.mrb[3].mxu1  ;;  %v600_v22 = vsel %vm525_vm2, %v596_v20, -inf }
 0x243   : > { %601 = vmax.xlane.f32.xlu1 %v600_v22 }
 0x245   : > { %v762_v23 = vpop.f32.mrb[0].mxu0 }
 0x246   : > { %v1697_v24 = vpop.f32.mrb[1].mxu0  ;;  %v766_v25 = vsel %vm525_vm2, %v762_v23, -inf }
 0x247   : > { %767 = vmax.xlane.f32.xlu0 %v766_v25  ;;  %v1618_v25 = vld [vmem:[%s2299_s4] ss:$0 sm:$0xff] }
 0x249   : > { %v933_v26 = vpop.f32.mrb[2].mxu0 }
 0x24a   : > { %v1707_v27 = vpop.f32.mrb[3].mxu0  ;;  %v937_v28 = vsel %vm525_vm2, %v933_v26, -inf }
 0x24b   : > { %938 = vmax.xlane.f32.xlu0 %v937_v28 }
 0x24d   : > { %v1104_v29 = vpop.f32.mrb[4].mxu0 }
 0x24e   : > { %v1717_v30 = vpop.f32.mrb[5].mxu0  ;;  %v1108_v31 = vsel %vm525_vm2, %v1104_v29, -inf }
 0x24f   : > { %1109 = vmax.xlane.f32.xlu1 %v1108_v31 }
 0x260   : > { %777 = vrot.lane.b32.xlu1 %v2104_v11, %s1944_s15 }
 0x2d0   : > { %v602_v32 = vpop.xlane.xlu1 %601 }
 0x2d1   : > { %v603_v33 = vsub.f32 %v596_v20, %v602_v32 }
 0x2d3   : > { %v604_v34 = vmul.f32 1.442695, %v603_v33  ;;  %v1319_v33 = vld [vmem:[%s2302_s7 + $0x8] sm:$0xff] }
 0x2d4   : > { %v768_v35 = vpop.xlane.xlu0 %767 }
 0x2d5   : > { %1850 = vpow2.f32 %v604_v34  ;;  %v769_v36 = vsub.f32 %v762_v23, %v768_v35  ;;  %v1321_v35 = vld [vmem:[%s2302_s7 + $0x18] sm:$0xff] }
 0x2d7   : > { %v770_v37 = vmul.f32 1.442695, %v769_v36 }
 0x2d8   : > { %v939_v47 = vpop.xlane.xlu0 %938 }
 0x2d9   : > { %1852 = vpow2.f32 %v770_v37  ;;  %v940_v48 = vsub.f32 %v933_v26, %v939_v47  ;;  %v1403_v37 = vld [vmem:[%s2304_s9] sm:$0xff] }
 0x2db   : > { %v941_v49 = vmul.f32 1.442695, %v940_v48 }
 0x2dc   : > { %v1110_v38 = vpop.xlane.xlu1 %1109 }
 0x2dd   : > { %v1111_v39 = vsub.f32 %v1104_v29, %v1110_v38  ;;  %v1404_v38 = vld [vmem:[%s2304_s9 + $0x8] sm:$0xff] }
 0x2df   : > { %v1851_v40 = vpop.eup %1850  ;;  %v1112_v41 = vmul.f32 1.442695, %v1111_v39  ;;  %v1405_v39 = vld [vmem:[%s2304_s9 + $0x10] sm:$0xff] }
 0x2e0   : > { %v606_v42 = vsel %vm525_vm2, %v1851_v40, 0.0  ;;  %v778_v52 = vpop.permute.xlu1 %777 }
 0x2e1   : > { %1854 = vpow2.f32 %v1112_v41  ;;  %607 = vadd.xlane.f32.xlu0 %v606_v42  ;;  %v1406_v41 = vld [vmem:[%s2304_s9 + $0x18] sm:$0xff] }
 0x2e2   : > { %1856 = vpow2.f32 %v941_v49  ;;  %v1786_v42 = vpack.c.bf16 %v1406_v41, %v1405_v39 }
 0x2e3   : > { %v1853_v43 = vpop.eup %1852 }
 0x2e4   : > { %v772_v44 = vsel %vm525_vm2, %v1853_v43, 0.0 }
 0x2e5   : > { %773 = vadd.xlane.f32.xlu1 %v772_v44  ;;  %v1408_v44 = vld [vmem:[%s2304_s9 + $0x28] sm:$0xff] }
 0x2eb   : > { %v1855_v45 = vpop.eup %1854 }
 0x2ec   : > { %v1114_v46 = vsel %vm525_vm2, %v1855_v45, 0.0  ;;  %v1857_v50 = vpop.eup %1856 }
 0x2ed   : > { %1115 = vadd.xlane.f32.xlu1 %v1114_v46  ;;  %v943_v51 = vsel %vm525_vm2, %v1857_v50, 0.0 }
 0x2f7   : > { %611 = vrot.lane.b32.xlu0 %v2104_v11, %s1945_s16  ;;  %s429_s16 = sand.u32 1, %s1924_s26  }
 0x2fe   : > { %948 = vrot.lane.b32.xlu1 %v2104_v11, %s1946_s20  ;;  %s1602_s20 = sshll.u32 %s429_s16, 3 }
 0x2ff   : > { %s431_s30 = scalar_lea.vmem [#allocation3], %s1602_s20  ;;  %s1874_s20 = sshll.u32 %s1951_s29, 4  ;;  %s1875_s20 = int_to_ptr.vmem [resolvable:$false] %s1874_s20 }
 0x300   : > { %s1539_s1 = sshll.u32 %s431_s30, 4  ;;  %s2254_s1 = int_to_ptr.vmem [resolvable:$true] %s1539_s1 }
 0x301   : > { %p1877_p0 = scmp.lt.s32.totalorder %s2254_s1, %s1875_s20 }
 0x316   : > { %944 = vadd.xlane.f32.xlu0 %v943_v51 }
 0x32c   : > { %1119 = vrot.lane.b32.xlu0 %v2104_v11, %s1947_s21  ;;  %v1202_v11 = vld [vmem:[%s2318_s3] sm:$0xff]  ;;  %s2252_s3 = scalar_lea.hbm %s2308_s13, %s1629_s24  ;;  %s1526_s21 = scalar_lea.sflag [#allocation4], %s429_s16 }
 0x32d   : > { %v1771_v13 = vpack.c.bf16 %v1203_v12, %v1202_v11 }
 0x32f   : > { %1772 = vmatpush3.bf16.msra.mxu0 %v1771_v13 }
 0x330   : > { %1773 = vmatprep.subr.bf16.mxu0 %v1934_v3 }
 0x333   : > { %1775 = vmatpush3.bf16.msra.mxu0 %v1774_v16 }
 0x334   : > { %1782 = vmatprep.subr.bf16.mxu0 %v1934_v3 }
 0x36e   : > { %v608_v53 = vpop.xlane.xlu0 %607 }
 0x36f   : > { %1858 = vrcp.f32 %v608_v53 }
 0x372   : > { %v612_v54 = vpop.permute.xlu0 %611  ;;  %v774_v55 = vpop.xlane.xlu1 %773 }
 0x373   : > { %1860 = vrcp.f32 %v774_v55  ;;  %1689 = vmatpush3.msra.mxu1 %v612_v54  ;;  %v1620_v55 = vld [vmem:[%s2300_s5] ss:$0 sm:$0xff] }
 0x374   : > { %1698 = vmatprep.subr.mxu1 %v1936_v6 }
 0x379   : > { %v1859_v56 = vpop.eup %1858 }
 0x37a   : > { %v610_v57 = vmul.f32 %v1859_v56, %v1851_v40  ;;  %v1116_v58 = vpop.xlane.xlu1 %1115  ;;  %v1783_v40 = vpack.c.bf16 %v1404_v38, %v1403_v37 }
 0x37c   : > { %1691 = vmatmul.mubr.msk.f32.vlgmr.msra.gmra.mrb[4].mxu1 %vm525_vm2, %v610_v57  ;;  %v1621_v57 = vld [vmem:[%s2301_s6] ss:$0 sm:$0xff] }
 0x37d   : > { %v1861_v59 = vpop.eup %1860  ;;  %1699 = vmatpush3.msra.mxu1 %v778_v52  ;;  %1700 = vmatprep.mubr.msk.f32.mxu1 %vm1935_vm0, %v1936_v6 }
 0x37e   : > { %v776_v60 = vmul.f32 %v1861_v59, %v1853_v43  ;;  %v949_v61 = vpop.permute.xlu1 %948  ;;  %1708 = vmatprep.subr.mxu1 %v1936_v6  ;;  %v1407_v43 = vld [vmem:[%s2304_s9 + $0x20] sm:$0xff]  ;;  %v1409_v59 = vld [vmem:[%s2304_s9 + $0x30] sm:$0xff] }
 0x380   : > { %1701 = vmatmul.mubr.msk.f32.vlgmr.msra.gmra.mrb[6].mxu1 %vm525_vm2, %v776_v60  ;;  %v1410_v60 = vld [vmem:[%s2304_s9 + $0x38] sm:$0xff] }
 0x381   : > { %1709 = vmatpush3.msra.mxu1 %v949_v61  ;;  %1710 = vmatprep.mubr.msk.f32.mxu1 %vm1935_vm0, %v1936_v6  ;;  %v1792_v61 = vpack.c.bf16 %v1410_v60, %v1409_v59 }
 0x382   : > { %1718 = vmatprep.subr.mxu1 %v1936_v6 }
 0x3a3   : > { %v945_v62 = vpop.xlane.xlu0 %944 }
 0x3a4   : > { %1862 = vrcp.f32 %v945_v62  ;;  %v1622_v62 = vld [vmem:[%s2303_s8] ss:$0 sm:$0xff] }
 0x3a5   : > { %1864 = vrcp.f32 %v1116_v58 }
 0x3a7   : > { %v1120_v2 = vpop.permute.xlu0 %1119 }
 0x3ae   : > { %v1863_v63 = vpop.eup %1862 }
 0x3af   : > { %v947_v0 = vmul.f32 %v1863_v63, %v1857_v50  ;;  %v1865_v1 = vpop.eup %1864 }
 0x3b0   : > { %v1118_v4 = vmul.f32 %v1865_v1, %v1855_v45  ;;  %v1789_v45 = vpack.c.bf16 %v1408_v44, %v1407_v43 }
 0x3b1   : > { %1711 = vmatmul.mubr.msk.f32.vlgmr.msra.gmra.mrb[8].mxu1 %vm525_vm2, %v947_v0 }
 0x3b2   : > { %1719 = vmatpush3.msra.mxu1 %v1120_v2  ;;  %1720 = vmatprep.mubr.msk.f32.mxu1 %vm1935_vm0, %v1936_v6 }
 0x3b3   : > { %1776 = vmatprep.subr.bf16.mxu1 %v1934_v3 }
 0x3b5   : > { %1721 = vmatmul.mubr.msk.f32.vlgmr.msra.gmra.mrb[10].mxu1 %vm525_vm2, %v1118_v4  ;;  %v1624_v4 = vld [vmem:[%s2305_s10] ss:$0 sm:$0xff] }
 0x3b6   : > { %1742 = vmatprep.mubr.msk.f32.mxu1 %vm1935_vm0, %v1936_v6 }
 0x44f   : > { %v683_v5 = vpop.f32.mrb[4].mxu1 }
 0x450   : > { %687 = vst.msk [vmem:[#allocation2] sm:$0xff] %vm525_vm2, %v683_v5  ;;  %v1692_v7 = vpop.f32.mrb[5].mxu1 }
 0x453   : > { %v849_v9 = vpop.f32.mrb[6].mxu1 }
 0x454   : > { %854 = vrot.lane.b32.xlu1 %v849_v9, %s1948_s22  ;;  %v1702_v10 = vpop.f32.mrb[7].mxu1  ;;  %s1949_s22 = smov 16  }
 0x484   : > { %v1020_v17 = vpop.f32.mrb[8].mxu1 }
 0x485   : > { %1025 = vrot.lane.b32.xlu0 %v1020_v17, %s1949_s22  ;;  %v1712_v18 = vpop.f32.mrb[9].mxu1  ;;  %s1870_s22 = scalar_lea.vmem %s2254_s1, 128 }
 0x486   : > { %p1871_p11 = scmp.ne.s32.totalorder %s2254_s1, %s1870_s22 }
 0x488   : > { %v1191_v19 = vpop.f32.mrb[10].mxu1  ;;  %p1872_p12 = pnand %p1871_p11, %p2060_p5 }
 0x489   : > { %1196 = vrot.lane.b32.xlu1 %v1191_v19, %s1950_s23  ;;  %v1722_v20 = vpop.f32.mrb[11].mxu1  ;;  %s1876_s23 = scalar_lea.vmem %s1875_s20, 256 }
 0x48a   : > { %p1873_p13 = pneg %p1872_p12  ;;  %p1878_p1 = scmp.lt.s32.totalorder %s1876_s23, %s1870_s22 }
 0x48c   : > { %p1879_p2 = por %p1878_p1, %p1877_p0 }
 0x48e   : > { %p1880_p3 = pnand %p1879_p2, %p1873_p13 }
 0x4c6   : > { %v855_v21 = vpop.permute.xlu1 %854 }
 0x4c7   : > { %858 = vst.msk [vmem:[#allocation2] sm:$0xff] %vm857_vm3, %v855_v21 }
 0x4f7   : > { %v1026_v22 = vpop.permute.xlu0 %1025 }
 0x4f8   : > { %1029 = vst.msk [vmem:[#allocation2] sm:$0xff] %vm1028_vm4, %v1026_v22 }
 0x4fb   : > { %v1197_v23 = vpop.permute.xlu1 %1196 }
 0x4fc   : > { %1200 = vst.msk [vmem:[#allocation2] sm:$0xff] %vm1199_vm5, %v1197_v23  ;;  %v1626_v23 = vld [vmem:[%s2306_s11] ss:$0 sm:$0xff] }
 0x503   : > { %v1201_v24 = vld [vmem:[#allocation2] sm:$0xff] }
 0x504   : > { %1732 = vmatmul.mubr.msk.f32.vlgmr.msra.gmra.mrb[6].mxu0 %vm448_vm1, %v1201_v24 }
 0x505   : > { %1761 = vmatprep.mubr.msk.f32.mxu0 %vm1935_vm0, %v1936_v6  ;;  %v1318_v6 = vld [vmem:[%s2302_s7] sm:$0xff]  ;;  %1784 = vmatpush3.bf16.msra.mxu0 %v1783_v40 }
 0x506   : > { %v1777_v34 = vpack.c.bf16 %v1319_v33, %v1318_v6  ;;  %1785 = vmatprep.subr.bf16.mxu0 %v1934_v3 }
 0x508   : > { %1778 = vmatpush3.bf16.msra.mxu1 %v1777_v34 }
 0x509   : > { %1779 = vmatprep.subr.bf16.mxu1 %v1934_v3  ;;  %1787 = vmatpush3.bf16.msra.mxu0 %v1786_v42 }
 0x50a   : > { %1788 = vmatprep.subr.bf16.mxu0 %v1934_v3 }
 0x50d   : > { %1790 = vmatpush3.bf16.msra.mxu0 %v1789_v45 }
 0x50e   : > { %1791 = vmatprep.subr.bf16.mxu0 %v1934_v3 }
 0x511   : > { %1793 = vmatpush3.bf16.msra.mxu0 %v1792_v61 }
 0x5d7   : > { %v1282_v26 = vpop.f32.mrb[6].mxu0 }
 0x5d8   : > { %v1283_v27 = vadd.f32 %v1618_v25, %v1282_v26  ;;  %v1733_v28 = vpop.f32.mrb[7].mxu0  ;;  %v1627_v25 = vld [vmem:[%s2307_s12] ss:$0 sm:$0xff] }
 0x5da   : > { %v1286_v29 = vadd.f32 %v1283_v27, %v2094_v8  ;;  %v1320_v8 = vld [vmem:[%s2302_s7 + $0x10] sm:$0xff] }
 0x5db   : > { %v1780_v36 = vpack.c.bf16 %v1321_v35, %v1320_v8 }
 0x5dc   : > { %v1289_v30 = vsel %vm448_vm1, %v1286_v29, 0.0  ;;  %v1293_v31 = vmul.f32 %v1286_v29, %v1286_v29 }
 0x5dd   : > { %1290 = vadd.xlane.f32.xlu0 %v1289_v30  ;;  %1781 = vmatpush3.bf16.msra.mxu1 %v1780_v36 }
 0x5de   : > { %v1294_v32 = vsel %vm448_vm1, %v1293_v31, 0.0 }
 0x5df   : > { %1295 = vadd.xlane.f32.xlu1 %v1294_v32 }
 0x66a   : > { %v1291_v46 = vpop.xlane.xlu0 %1290 }
 0x66b   : > { %v1292_v47 = vmul.f32 0.03125, %v1291_v46 }
 0x66c   : > { %v1296_v48 = vpop.xlane.xlu1 %1295 }
 0x66d   : > { %v1298_v49 = vmul.f32 %v1292_v47, %v1292_v47  ;;  %v1297_v50 = vmul.f32 0.03125, %v1296_v48  ;;  %v1300_v53 = vsub.f32 %v1286_v29, %v1292_v47 }
 0x66f   : > { %v1299_v51 = vsub.f32 %v1297_v50, %v1298_v49 }
 0x671   : > { %v1301_v52 = vadd.f32 1e-05, %v1299_v51 }
 0x673   : > { %1866 = vrsqrt.f32 %v1301_v52 }
 0x67d   : > { %v1867_v54 = vpop.eup %1866 }
 0x67e   : > { %v1303_v56 = vmul.f32 %v1867_v54, %v1300_v53 }
 0x680   : > { %v1310_v3 = vmul.f32 %v1620_v55, %v1303_v56 }
 0x682   : > { %v1317_v58 = vadd.f32 %v1621_v57, %v1310_v3 }
 0x684   : > { %1743 = vmatmul.mubr.msk.f32.vlgmr.msra.gmra.mrb[12].mxu1 %vm448_vm1, %v1317_v58 }
 0x757   : > { %v1398_v63 = vpop.f32.mrb[12].mxu1 }
 0x758   : > { %v1399_v0 = vadd.f32 %v1622_v62, %v1398_v63  ;;  %v1744_v1 = vpop.f32.mrb[13].mxu1 }
 0x75a   : > { %v1402_v2 = vmax.f32 %v1399_v0, 0.0 }
 0x75c   : > { %1762 = vmatmul.mubr.msk.f32.vlgmr.msra.gmra.mrb[8].mxu0 %vm1418_vm6, %v1402_v2 }
 0x82f   : > { %v1488_v5 = vpop.f32.mrb[8].mxu0 }
 0x830   : > { %v1489_v7 = vadd.f32 %v1624_v4, %v1488_v5  ;;  %v1763_v9 = vpop.f32.mrb[9].mxu0 }
 0x832   : > { %v1492_v10 = vadd.f32 %v1489_v7, %v1317_v58 }
 0x834   : > { %v1495_v11 = vsel %vm448_vm1, %v1492_v10, 0.0  ;;  %v1499_v12 = vmul.f32 %v1492_v10, %v1492_v10 }
 0x835   : > { %1496 = vadd.xlane.f32.xlu0 %v1495_v11 }
 0x836   : > { %v1500_v13 = vsel %vm448_vm1, %v1499_v12, 0.0 }
 0x839   : > { %1501 = vadd.xlane.f32.xlu0 %v1500_v13 }
 0x8c2   : > { %v1497_v14 = vpop.xlane.xlu0 %1496 }
 0x8c3   : > { %v1498_v15 = vmul.f32 0.03125, %v1497_v14 }
 0x8c5   : > { %v1504_v17 = vmul.f32 %v1498_v15, %v1498_v15  ;;  %v1506_v21 = vsub.f32 %v1492_v10, %v1498_v15 }
 0x8c6   : > { %v1502_v16 = vpop.xlane.xlu0 %1501 }
 0x8c7   : > { %v1503_v18 = vmul.f32 0.03125, %v1502_v16 }
 0x8c9   : > { %v1505_v19 = vsub.f32 %v1503_v18, %v1504_v17 }
 0x8cb   : > { %v1507_v20 = vadd.f32 1e-05, %v1505_v19 }
 0x8cd   : > { %1868 = vrsqrt.f32 %v1507_v20 }
 0x8d7   : > { %v1869_v22 = vpop.eup %1868 }
 0x8d8   : > { %v1509_v24 = vmul.f32 %v1869_v22, %v1506_v21 }
 0x8da   : > { %v1516_v26 = vmul.f32 %v1626_v23, %v1509_v24 }
 0x8dc   : > { %v1523_v27 = vadd.f32 %v1627_v25, %v1516_v26 }
 0x8de   : > { %1524 = vst.msk [vmem:[%s431_s30] sm:$0xff] %vm448_vm1, %v1523_v27 }
 0x8df   : > { %1883 = shalt.err (!%p1880_p3)
}
 0x8e0   : > { %s1884_s2 = scalar_lea.hbm %s2252_s3, 128  ;;  %s1888_s24 = scalar_lea.hbm %s2308_s13, 256 }
 0x8e1   : > { %p1885_p4 = scmp.ne.s32.totalorder %s2252_s3, %s1884_s2  ;;  %p1889_p9 = scmp.lt.u32.totalorder %s2252_s3, %s2308_s13 }
 0x8e2   : > { %p1890_p10 = scmp.lt.u32.totalorder %s1888_s24, %s1884_s2  ;;  %p1892_p12 = scmp.lt.u32.totalorder %s1884_s2, %s2252_s3 }
 0x8e3   : > { %p1886_p7 = pnand %p1885_p4, %p2060_p5 }
 0x8e4   : > { %p1891_p11 = por %p1890_p10, %p1889_p9 }
 0x8e5   : > { %p1887_p8 = pneg %p1886_p7 }
 0x8e6   : > { %p1893_p13 = por %p1892_p12, %p1891_p11 }
 0x8e8   : > { %p1894_p0 = pnand %p1893_p13, %p1887_p8 }
 0x8ea   : > { %1897 = shalt.err (!%p1894_p0)
}
 0x8eb   : > { %1794 = dma.vmem_to_hbm [thread:$0]  (%p2060_p5), %s2254_s1, 128, %s2252_s3, %s1526_s21  }
 0x8ec PF: > { %p1800_p1 = scmp.ge.s32.totalorder %s1932_s28, 2  ;;  %s1551_s22 = sand.u32 1, %s1920_s25  }
 0x8ed   : > { %s1552_s29 = scalar_lea.sflag [#allocation4], %s1551_s22 }
 0x8ee   : > { %p1797_p2 = pnand %p1800_p1, %p2064_p6 }
 0x8f0   : > { %1915 = dma.done.wait (!%p1797_p2), %s1552_s29, 128  }
 0x8f1   : > { %1917 = vsyncadd (!%p1797_p2), %s1552_s29, 4294967168  ;;  %p23_p3 = scmp.ge.s32.totalorder %s2047_s14, 4   ;;  %s2319_s25 = smov %s1924_s26 }
 0x8f2   : > { %s2320_s26 = smov %s1928_s27  ;;  %s2321_s27 = smov %s2058_s17 }
 0x8f3   : > { %s2322_s28 = smov %s2047_s14  ;;  %25 = sbr.rel (!%p23_p3) target bundleno = 8 (0x8), region = 107 }
 0x8fa   :  { %1557 = vsyncpa [#allocation4], 1 }
 0x8fb   :  { %1559 = vsyncpa [#allocation4 + $0x1], 1 }

</bundles_post_ra>
